<compile_context>
chip_gen: v6e
topology: v6e:2x2x1
jax: 0.10.0
libtpu: 0.0.40
codegen_flags: <defaults>
</compile_context>

<pallas_src>
import functools

import jax
import jax.numpy as jnp
import numpy as np
from jax.experimental import pallas as pl
from jax.experimental.pallas import tpu as pltpu


# ----------------------------------------------------------------------------
# Pallas kernel: one-shot input projection -> tanh-RNN recurrence over T steps
# -> fused (machine-embedding + concat + FC1, ReLU) -> output FC (ReLU).
# Static dims are bound via functools.partial.
# ----------------------------------------------------------------------------
def decoder_step1_kernel(x_ref, state_ref, wslab_ref, bslab_ref, out_ref,
                         *, dp, h_dim, f1_dim, d_out):
    Bp = state_ref.shape[0]                    # padded batch (multiple of 8)
    T = x_ref.shape[0] // Bp                   # exact by construction

    # --- unpack the packed weight / bias slabs (static, sublane-aligned rows) -
    r0 = 0
    w_x   = wslab_ref[r0:r0 + dp, :h_dim];        r0 += dp        # (Dp, H)
    w_hh  = wslab_ref[r0:r0 + h_dim, :h_dim];     r0 += h_dim     # (H, H)
    w_fc1 = wslab_ref[r0:r0 + h_dim, :f1_dim];    r0 += h_dim     # (H, F1)
    w_out = wslab_ref[r0:r0 + f1_dim, :d_out]                     # (F1, Dout)

    b_x   = bslab_ref[0:1, :h_dim]                                # (1, H)
    w_m   = bslab_ref[1:2, :f1_dim]                               # (1, F1)
    b_f1  = bslab_ref[2:3, :f1_dim]                               # (1, F1)
    b_out = bslab_ref[3:4, :d_out]                                # (1, Dout)

    h0 = state_ref[:, :h_dim]                                     # (Bp, H)
    nm = state_ref[:, h_dim:h_dim + 1]                            # (Bp, 1)

    # --- one-shot input projection for ALL T steps (single MXU matmul) --------
    z = jnp.dot(x_ref[...], w_x,
                preferred_element_type=jnp.float32) + b_x         # (T*Bp, H)

    # --- tanh RNN recurrence: only h @ w_hh remains on the serial path --------
    # T is small (8) -> static unroll; switch to lax.fori_loop(unroll=8) if
    # multiple decode steps get fused and the trip count grows.
    h = h0
    for t in range(T):
        z_t = z[t * Bp:(t + 1) * Bp, :]                           # (Bp, H) tile
        h = jnp.tanh(z_t + jnp.dot(h, w_hh,
                                   preferred_element_type=jnp.float32))

    # --- fused machine-embedding + concat + FC1 (ReLU), then output FC (ReLU) -
    f1 = jnp.maximum(
        jnp.dot(h, w_fc1, preferred_element_type=jnp.float32)
        + nm * w_m                                                # (Bp,1)*(1,F1)
        + b_f1,
        0.0)
    out = jnp.maximum(
        jnp.dot(f1, w_out, preferred_element_type=jnp.float32) + b_out,
        0.0)

    out_ref[...] = out.astype(out_ref.dtype)


# ----------------------------------------------------------------------------
# One-off (per decode sequence) parameter folding + packing. Call ONCE and
# reuse the result across decode steps — not on the per-step path.
# ----------------------------------------------------------------------------
def prepare_decoder_params(params):
    d_in = params["w_emb"].shape[0]
    H = params["w_hh"].shape[0]
    F1 = params["w_fc1"].shape[1]
    D_out = params["w_out"].shape[1]

    # algebraic folds (exact reassociations of the reference math)
    w_x = params["w_emb"] @ params["w_ih"]                                  # (D_in, H)
    b_x = params["b_emb"] @ params["w_ih"] + params["b_ih"] + params["b_hh"]  # (1, H)
    w_fc1_h = params["w_fc1"][:H, :]                                        # (H, F1)
    w_fc1_m = params["w_fc1"][H:, :]                                        # (M, F1)
    w_m_proj = params["w_m"] @ w_fc1_m                                      # (1, F1)
    b_fc1_fused = params["b_m"] @ w_fc1_m + params["b_fc1"]                 # (1, F1)

    # pack into two slabs (sublane-aligned rows, zero padding)
    dp = ((d_in + 7) // 8) * 8
    n_max = max(H, F1, D_out)
    kw = dp + 2 * H + F1
    kw_pad = ((kw + 7) // 8) * 8

    wslab = jnp.zeros((kw_pad, n_max), jnp.float32)
    r0 = 0
    wslab = wslab.at[r0:r0 + d_in, :H].set(w_x);          r0 = dp
    wslab = wslab.at[r0:r0 + H, :H].set(params["w_hh"]);  r0 += H
    wslab = wslab.at[r0:r0 + H, :F1].set(w_fc1_h);        r0 += H
    wslab = wslab.at[r0:r0 + F1, :D_out].set(params["w_out"])

    bslab = jnp.zeros((8, n_max), jnp.float32)
    bslab = bslab.at[0, :H].set(b_x[0])
    bslab = bslab.at[1, :F1].set(w_m_proj[0])
    bslab = bslab.at[2, :F1].set(b_fc1_fused[0])
    bslab = bslab.at[3, :D_out].set(params["b_out"][0])

    return {"wslab": wslab, "bslab": bslab,
            "dims": (d_in, dp, H, F1, D_out)}


# ----------------------------------------------------------------------------
# Wrapper: mirrors DecoderStep1Stage.forward(prev_job_proc_times, ptr_h_state,
#                                            ptr_c_state, num_machines_scalar)
# rnn_type='RNN' (module default) so ptr_c_state is accepted but unused.
# ----------------------------------------------------------------------------
def decoder_step1stage(prev_job_proc_times, ptr_h_state, ptr_c_state,
                       num_machines_scalar, packed):
    del ptr_c_state  # only used for LSTM; default rnn_type is 'RNN'
    B, T, d_in = prev_job_proc_times.shape
    d_in_p, dp, H, F1, D_out = packed["dims"]
    assert d_in == d_in_p
    Bp = max(8, ((B + 7) // 8) * 8)            # pad batch to a full sublane tile

    # time-major, batch- and feature-padded flat input: (T*Bp, Dp)
    x = jnp.transpose(prev_job_proc_times, (1, 0, 2))               # (T, B, Din)
    x = jnp.pad(x, ((0, 0), (0, Bp - B), (0, dp - d_in)))
    x_flat = x.reshape(T * Bp, dp)

    # pack per-call activations into one operand: [h0 | nm] -> (Bp, H+1)
    h0 = jnp.pad(ptr_h_state[-1], ((0, Bp - B), (0, 0)))            # (Bp, H)
    nm = jnp.pad(num_machines_scalar, ((0, Bp - B), (0, 0)))        # (Bp, 1)
    state = jnp.concatenate([h0, nm], axis=1)                       # (Bp, H+1)

    wslab, bslab = packed["wslab"], packed["bslab"]

    cost = pl.CostEstimate(
        flops=2 * (T * Bp * dp * H + T * Bp * H * H
                   + Bp * H * F1 + Bp * F1 * D_out),
        transcendentals=T * Bp * H,
        bytes_accessed=4 * (x_flat.size + state.size + wslab.size
                            + bslab.size + Bp * D_out),
    )

    vmem = pl.BlockSpec(memory_space=pltpu.MemorySpace.VMEM)
    kernel = functools.partial(decoder_step1_kernel,
                               dp=dp, h_dim=H, f1_dim=F1, d_out=D_out)

    # No grid: a single program; total working set is ~15 KB so no VMEM-limit
    # tuning or extra buffering is needed on any generation (incl. v7x 64 MiB).
    out = pl.pallas_call(
        kernel,
        out_shape=jax.ShapeDtypeStruct((Bp, D_out), jnp.float32),
        in_specs=[vmem, vmem, vmem, vmem],
        out_specs=vmem,
        cost_estimate=cost,
    )(x_flat, state, wslab, bslab)

    return out[:B]


# ----------------------------------------------------------------------------
# Pure-JAX reference (mirrors the PyTorch forward semantics exactly, un-folded).
# ----------------------------------------------------------------------------
def reference_forward(prev_job_proc_times, ptr_h_state, ptr_c_state,
                      num_machines_scalar, p):
    del ptr_c_state
    emb = prev_job_proc_times @ p["w_emb"] + p["b_emb"]      # (B, T, E)
    h = ptr_h_state[-1]
    for t in range(prev_job_proc_times.shape[1]):
        h = jnp.tanh(emb[:, t, :] @ p["w_ih"] + p["b_ih"]
                     + h @ p["w_hh"] + p["b_hh"])
    m = num_machines_scalar @ p["w_m"] + p["b_m"]
    feat = jnp.concatenate([h, m], axis=1)
    f1 = jax.nn.relu(feat @ p["w_fc1"] + p["b_fc1"])
    return jax.nn.relu(f1 @ p["w_out"] + p["b_out"])


# ----------------------------------------------------------------------------
# Deterministic parameter init (PyTorch-style U(-1/sqrt(fan_in), 1/sqrt(fan_in)))
# ----------------------------------------------------------------------------
def init_params(key, d_in, emb_dim, hid_dim, m_emb_dim, fc_hidden, d_out):
    ks = jax.random.split(key, 16)

    def lin(kw, kb, fan_in, fan_out):
        bound = 1.0 / np.sqrt(fan_in)
        w = jax.random.uniform(kw, (fan_in, fan_out), jnp.float32, -bound, bound)
        b = jax.random.uniform(kb, (1, fan_out), jnp.float32, -bound, bound)
        return w, b

    p = {}
    p["w_emb"], p["b_emb"] = lin(ks[0], ks[1], d_in, emb_dim)
    # nn.RNN weights use bound 1/sqrt(hidden_dim)
    rb = 1.0 / np.sqrt(hid_dim)
    p["w_ih"] = jax.random.uniform(ks[2], (emb_dim, hid_dim), jnp.float32, -rb, rb)
    p["b_ih"] = jax.random.uniform(ks[3], (1, hid_dim), jnp.float32, -rb, rb)
    p["w_hh"] = jax.random.uniform(ks[4], (hid_dim, hid_dim), jnp.float32, -rb, rb)
    p["b_hh"] = jax.random.uniform(ks[5], (1, hid_dim), jnp.float32, -rb, rb)
    p["w_m"], p["b_m"] = lin(ks[6], ks[7], 1, m_emb_dim)
    p["w_fc1"], p["b_fc1"] = lin(ks[8], ks[9], hid_dim + m_emb_dim, fc_hidden)
    p["w_out"], p["b_out"] = lin(ks[10], ks[11], fc_hidden, d_out)
    return p


if __name__ == "__main__":
    # Small shapes consistent with the module:
    B, T = 2, 8                 # batch, sequence length
    D_IN = 4                    # scalar_input_dim
    EMB = 32                    # embedding_dim
    HID = 32                    # hidden_dim == rnn1_output_dim
    M_EMB = 16                  # m_embedding_dim
    FC_HID = 32                 # fc_hidden_dims=[32]
    D_OUT = 32                  # di_output_dim
    NUM_LAYERS = 1

    key = jax.random.PRNGKey(0)
    kx, kh, kc, km, kp = jax.random.split(key, 5)

    prev_job_proc_times = jax.random.uniform(kx, (B, T, D_IN), jnp.float32)
    ptr_h_state = jax.random.normal(kh, (NUM_LAYERS, B, HID), jnp.float32)
    ptr_c_state = jax.random.normal(kc, (NUM_LAYERS, B, HID), jnp.float32)  # unused (RNN)
    num_machines_scalar = jax.random.uniform(km, (B, 1), jnp.float32, 1.0, 8.0)

    params = init_params(kp, D_IN, EMB, HID, M_EMB, FC_HID, D_OUT)

    # Hoisted, once-per-sequence fold + pack (device-resident across steps).
    packed = jax.tree_util.tree_map(
        lambda x: x, prepare_decoder_params(params))

    out = decoder_step1stage(prev_job_proc_times, ptr_h_state, ptr_c_state,
                             num_machines_scalar, packed)
    out = jax.block_until_ready(out)

    ref = reference_forward(prev_job_proc_times, ptr_h_state, ptr_c_state,
                            num_machines_scalar, params)
    np.testing.assert_allclose(np.asarray(out), np.asarray(ref),
                               rtol=1e-3, atol=1e-3)

    print("KERNEL_OK")
</pallas_src>

<mosaic_0001>
module attributes {stable_mosaic.version = 11 : i64} {
  func.func @decoder_step1_kernel(%arg0: memref<64x8xf32, #tpu.memory_space<vmem>>, %arg1: memref<8x33xf32, #tpu.memory_space<vmem>>, %arg2: memref<104x32xf32, #tpu.memory_space<vmem>>, %arg3: memref<8x32xf32, #tpu.memory_space<vmem>>, %arg4: memref<8x32xf32, #tpu.memory_space<vmem>>) attributes {dimension_semantics = [], scalar_prefetch = 0 : i64, scratch_operands = 0 : i64, tpu.core_type = #tpu.core_type<tc>} {
    %c0 = arith.constant 0 : index
    %c0_0 = arith.constant 0 : index
    %0 = vector.load %arg2[%c0, %c0_0] : memref<104x32xf32, #tpu.memory_space<vmem>>, vector<8x32xf32>
    %c8 = arith.constant 8 : index
    %c0_1 = arith.constant 0 : index
    %1 = vector.load %arg2[%c8, %c0_1] : memref<104x32xf32, #tpu.memory_space<vmem>>, vector<32x32xf32>
    %c40 = arith.constant 40 : index
    %c0_2 = arith.constant 0 : index
    %2 = vector.load %arg2[%c40, %c0_2] : memref<104x32xf32, #tpu.memory_space<vmem>>, vector<32x32xf32>
    %c72 = arith.constant 72 : index
    %c0_3 = arith.constant 0 : index
    %3 = vector.load %arg2[%c72, %c0_3] : memref<104x32xf32, #tpu.memory_space<vmem>>, vector<32x32xf32>
    %c0_4 = arith.constant 0 : index
    %c0_5 = arith.constant 0 : index
    %4 = vector.load %arg3[%c0_4, %c0_5] : memref<8x32xf32, #tpu.memory_space<vmem>>, vector<1x32xf32>
    %c1 = arith.constant 1 : index
    %c0_6 = arith.constant 0 : index
    %5 = vector.load %arg3[%c1, %c0_6] : memref<8x32xf32, #tpu.memory_space<vmem>>, vector<1x32xf32>
    %c2 = arith.constant 2 : index
    %c0_7 = arith.constant 0 : index
    %6 = vector.load %arg3[%c2, %c0_7] : memref<8x32xf32, #tpu.memory_space<vmem>>, vector<1x32xf32>
    %c3 = arith.constant 3 : index
    %c0_8 = arith.constant 0 : index
    %7 = vector.load %arg3[%c3, %c0_8] : memref<8x32xf32, #tpu.memory_space<vmem>>, vector<1x32xf32>
    %c0_9 = arith.constant 0 : index
    %c0_10 = arith.constant 0 : index
    %8 = vector.load %arg1[%c0_9, %c0_10] : memref<8x33xf32, #tpu.memory_space<vmem>>, vector<8x32xf32>
    %c0_11 = arith.constant 0 : index
    %c32 = arith.constant 32 : index
    %9 = vector.load %arg1[%c0_11, %c32] : memref<8x33xf32, #tpu.memory_space<vmem>>, vector<8x1xf32>
    %c0_12 = arith.constant 0 : index
    %c0_13 = arith.constant 0 : index
    %10 = vector.load %arg0[%c0_12, %c0_13] : memref<64x8xf32, #tpu.memory_space<vmem>>, vector<64x8xf32>
    %cst = arith.constant dense<0.000000e+00> : vector<64x32xf32>
    %11 = tpu.matmul %10, %0, %cst {dimension_numbers = #tpu.dot_dimension_numbers<[1], [0], [0], [1], [0, 0, 1, 1], [], []>} : vector<64x8xf32>, vector<8x32xf32>, vector<64x32xf32> -> vector<64x32xf32>
    %12 = vector.broadcast %4 : vector<1x32xf32> to vector<64x32xf32>
    %13 = arith.addf %11, %12 : vector<64x32xf32>
    %14 = vector.extract_strided_slice %13 {offsets = [0, 0], sizes = [8, 32], strides = [1, 1]} : vector<64x32xf32> to vector<8x32xf32>
    %cst_14 = arith.constant dense<0.000000e+00> : vector<8x32xf32>
    %15 = tpu.matmul %8, %1, %cst_14 {dimension_numbers = #tpu.dot_dimension_numbers<[1], [0], [0], [1], [0, 0, 1, 1], [], []>} : vector<8x32xf32>, vector<32x32xf32>, vector<8x32xf32> -> vector<8x32xf32>
    %16 = arith.addf %14, %15 : vector<8x32xf32>
    %17 = math.tanh %16 : vector<8x32xf32>
    %18 = vector.extract_strided_slice %13 {offsets = [8, 0], sizes = [8, 32], strides = [1, 1]} : vector<64x32xf32> to vector<8x32xf32>
    %cst_15 = arith.constant dense<0.000000e+00> : vector<8x32xf32>
    %19 = tpu.matmul %17, %1, %cst_15 {dimension_numbers = #tpu.dot_dimension_numbers<[1], [0], [0], [1], [0, 0, 1, 1], [], []>} : vector<8x32xf32>, vector<32x32xf32>, vector<8x32xf32> -> vector<8x32xf32>
    %20 = arith.addf %18, %19 : vector<8x32xf32>
    %21 = math.tanh %20 : vector<8x32xf32>
    %22 = vector.extract_strided_slice %13 {offsets = [16, 0], sizes = [8, 32], strides = [1, 1]} : vector<64x32xf32> to vector<8x32xf32>
    %cst_16 = arith.constant dense<0.000000e+00> : vector<8x32xf32>
    %23 = tpu.matmul %21, %1, %cst_16 {dimension_numbers = #tpu.dot_dimension_numbers<[1], [0], [0], [1], [0, 0, 1, 1], [], []>} : vector<8x32xf32>, vector<32x32xf32>, vector<8x32xf32> -> vector<8x32xf32>
    %24 = arith.addf %22, %23 : vector<8x32xf32>
    %25 = math.tanh %24 : vector<8x32xf32>
    %26 = vector.extract_strided_slice %13 {offsets = [24, 0], sizes = [8, 32], strides = [1, 1]} : vector<64x32xf32> to vector<8x32xf32>
    %cst_17 = arith.constant dense<0.000000e+00> : vector<8x32xf32>
    %27 = tpu.matmul %25, %1, %cst_17 {dimension_numbers = #tpu.dot_dimension_numbers<[1], [0], [0], [1], [0, 0, 1, 1], [], []>} : vector<8x32xf32>, vector<32x32xf32>, vector<8x32xf32> -> vector<8x32xf32>
    %28 = arith.addf %26, %27 : vector<8x32xf32>
    %29 = math.tanh %28 : vector<8x32xf32>
    %30 = vector.extract_strided_slice %13 {offsets = [32, 0], sizes = [8, 32], strides = [1, 1]} : vector<64x32xf32> to vector<8x32xf32>
    %cst_18 = arith.constant dense<0.000000e+00> : vector<8x32xf32>
    %31 = tpu.matmul %29, %1, %cst_18 {dimension_numbers = #tpu.dot_dimension_numbers<[1], [0], [0], [1], [0, 0, 1, 1], [], []>} : vector<8x32xf32>, vector<32x32xf32>, vector<8x32xf32> -> vector<8x32xf32>
    %32 = arith.addf %30, %31 : vector<8x32xf32>
    %33 = math.tanh %32 : vector<8x32xf32>
    %34 = vector.extract_strided_slice %13 {offsets = [40, 0], sizes = [8, 32], strides = [1, 1]} : vector<64x32xf32> to vector<8x32xf32>
    %cst_19 = arith.constant dense<0.000000e+00> : vector<8x32xf32>
    %35 = tpu.matmul %33, %1, %cst_19 {dimension_numbers = #tpu.dot_dimension_numbers<[1], [0], [0], [1], [0, 0, 1, 1], [], []>} : vector<8x32xf32>, vector<32x32xf32>, vector<8x32xf32> -> vector<8x32xf32>
    %36 = arith.addf %34, %35 : vector<8x32xf32>
    %37 = math.tanh %36 : vector<8x32xf32>
    %38 = vector.extract_strided_slice %13 {offsets = [48, 0], sizes = [8, 32], strides = [1, 1]} : vector<64x32xf32> to vector<8x32xf32>
    %cst_20 = arith.constant dense<0.000000e+00> : vector<8x32xf32>
    %39 = tpu.matmul %37, %1, %cst_20 {dimension_numbers = #tpu.dot_dimension_numbers<[1], [0], [0], [1], [0, 0, 1, 1], [], []>} : vector<8x32xf32>, vector<32x32xf32>, vector<8x32xf32> -> vector<8x32xf32>
    %40 = arith.addf %38, %39 : vector<8x32xf32>
    %41 = math.tanh %40 : vector<8x32xf32>
    %42 = vector.extract_strided_slice %13 {offsets = [56, 0], sizes = [8, 32], strides = [1, 1]} : vector<64x32xf32> to vector<8x32xf32>
    %cst_21 = arith.constant dense<0.000000e+00> : vector<8x32xf32>
    %43 = tpu.matmul %41, %1, %cst_21 {dimension_numbers = #tpu.dot_dimension_numbers<[1], [0], [0], [1], [0, 0, 1, 1], [], []>} : vector<8x32xf32>, vector<32x32xf32>, vector<8x32xf32> -> vector<8x32xf32>
    %44 = arith.addf %42, %43 : vector<8x32xf32>
    %45 = math.tanh %44 : vector<8x32xf32>
    %cst_22 = arith.constant dense<0.000000e+00> : vector<8x32xf32>
    %46 = tpu.matmul %45, %2, %cst_22 {dimension_numbers = #tpu.dot_dimension_numbers<[1], [0], [0], [1], [0, 0, 1, 1], [], []>} : vector<8x32xf32>, vector<32x32xf32>, vector<8x32xf32> -> vector<8x32xf32>
    %47 = vector.broadcast %9 : vector<8x1xf32> to vector<8x32xf32>
    %48 = vector.broadcast %5 : vector<1x32xf32> to vector<8x32xf32>
    %49 = arith.mulf %47, %48 : vector<8x32xf32>
    %50 = arith.addf %46, %49 : vector<8x32xf32>
    %51 = vector.broadcast %6 : vector<1x32xf32> to vector<8x32xf32>
    %52 = arith.addf %50, %51 : vector<8x32xf32>
    %cst_23 = arith.constant 0.000000e+00 : f32
    %53 = vector.broadcast %cst_23 : f32 to vector<8x32xf32>
    %54 = arith.maximumf %52, %53 : vector<8x32xf32>
    %cst_24 = arith.constant dense<0.000000e+00> : vector<8x32xf32>
    %55 = tpu.matmul %54, %3, %cst_24 {dimension_numbers = #tpu.dot_dimension_numbers<[1], [0], [0], [1], [0, 0, 1, 1], [], []>} : vector<8x32xf32>, vector<32x32xf32>, vector<8x32xf32> -> vector<8x32xf32>
    %56 = vector.broadcast %7 : vector<1x32xf32> to vector<8x32xf32>
    %57 = arith.addf %55, %56 : vector<8x32xf32>
    %cst_25 = arith.constant 0.000000e+00 : f32
    %58 = vector.broadcast %cst_25 : f32 to vector<8x32xf32>
    %59 = arith.maximumf %57, %58 : vector<8x32xf32>
    %c0_26 = arith.constant 0 : index
    %c0_27 = arith.constant 0 : index
    %60 = vector.load %arg4[%c0_26, %c0_27] : memref<8x32xf32, #tpu.memory_space<vmem>>, vector<8x32xf32>
    tpu.vector_store %arg4[%c0_26, %c0_27], %59 {strides = array<i32>} : memref<8x32xf32, #tpu.memory_space<vmem>>, vector<8x32xf32>,
    return
  }
}

</mosaic_0001>

<bundles_post_ra>
// kernel: tpu_custom_call.1
= control target key start
LH: loop header
LB: loop body
LE: loop exit
PB: predicated region body
PF: predicated region fallthrough
CT: control target
= control target key end

     0   :  { %vm48_vm0 = vcmask 64512   ;;  %v1208_v3 = vmov 0.0   ;;  %s1454_s0 = inlined_call_operand.vmem [shape: f32[64,8], index: 0, kind: input, shape index: {}]   ;;  %s1455_s1 = inlined_call_operand.vmem [shape: f32[8,33], index: 1, kind: input, shape index: {}]   ;;  %s1456_s2 = inlined_call_operand.vmem [shape: f32[104,32], index: 2, kind: input, shape index: {}]   ;;  %s1457_s3 = inlined_call_operand.vmem [shape: f32[8,32], index: 3, kind: input, shape index: {}]   ;;  %s1458_s4 = inlined_call_operand.hbm [shape: f32[8,32], index: 4, kind: output, shape index: {}]  }
   0x1   :  { %v18_v0 = vld [vmem:[%s1456_s2] sm:$0xff]  ;;  %1055 = vmatprep.subr.mxu1 %v1208_v3  ;;  %v37_v4 = vld [vmem:[%s1454_s0 + $0x8] sm:$0xff]  ;;  %v1256_v5 = vld [vmem:[%s1456_s2 + $0x18] sm:$0xff] }
   0x2   :  { %v36_v1 = vld [vmem:[%s1454_s0] sm:$0xff]  ;;  %1041 = vmatprep.subr.mxu0 %v18_v0 }
   0x3   :  { %v1246_v2 = vld [vmem:[%s1456_s2 + $0x20] sm:$0xff]  ;;  %1042 = vmatpush3.msra.mxu0 %v18_v0  ;;  %1043 = vmatprep.mubr.msk.f32.mxu0 %vm48_vm0, %v36_v1 }
   0x4   :  { %9 = vsyncpa [#allocation3], 0  ;;  %1056 = vmatpush3.msra.mxu1 %v1246_v2  ;;  %1044 = vmatmul.mubr.msk.f32.vlgmr.msra.gmra.mxu0 %vm48_vm0, %v37_v4  ;;  %v1264_v6 = vld [vmem:[%s1456_s2 + $0x10] sm:$0xff]  ;;  %vm1209_vm1 = vmmov 0   ;;  %v1274_v7 = vld [vmem:[%s1456_s2 + $0x8] sm:$0xff]  ;;  %vm178_vm2 = vcmask 261120  }
   0x5   :  { %1057 = vmatprep.subr.mxu1 %v1208_v3  ;;  %1063 = vmatprep.mubr.msk.f32.mxu1 %vm1209_vm1, %v1208_v3  ;;  %v1281_v8 = vld [vmem:[%s1455_s1] sm:$0xff]  ;;  %v38_v17 = vld [vmem:[%s1454_s0 + $0x10] sm:$0xff]  ;;  %v39_v18 = vld [vmem:[%s1454_s0 + $0x18] sm:$0xff]  ;;  %v1210_v63 = vmov 32   ;;  %s1211_s11 = smov [#allocation2]  }
   0x6   :  { %1058 = vmatpush3.msra.mxu1 %v1256_v5  ;;  %1077 = vmatprep.subr.mxu0 %v1208_v3  ;;  %v1308_v10 = vld [vmem:[%s1457_s3] ss:$0 sm:$0xff]  ;;  %v41_v20 = vld [vmem:[%s1454_s0 + $0x28] sm:$0xff]  ;;  %v42_v21 = vld [vmem:[%s1454_s0 + $0x30] sm:$0xff]  ;;  %s952_s12 = sshll.u32 %s1211_s11, 4  ;;  %s953_s12 = int_to_ptr.vmem [resolvable:$true] %s952_s12 }
   0x7   :  { %1059 = vmatprep.subr.mxu1 %v1208_v3  ;;  %1078 = vmatpush3.msra.mxu0 %v1246_v2  ;;  %v40_v19 = vld [vmem:[%s1454_s0 + $0x20] sm:$0xff]  ;;  %v43_v22 = vld [vmem:[%s1454_s0 + $0x38] sm:$0xff]  ;;  %v24_v61 = vld [vmem:[%s1456_s2 + $0x30] sm:$0xff]  ;;  %s1186_s13 = scalar_lea.vmem %s953_s12, 128  ;;  %p1191_p1 = scmp.lt.s32.totalorder %s953_s12, %s953_s12 }
   0x8   :  { %1060 = vmatpush3.msra.mxu1 %v1264_v6  ;;  %1079 = vmatprep.subr.mxu0 %v1208_v3  ;;  %v26_v59 = vld [vmem:[%s1456_s2 + $0x40] sm:$0xff]  ;;  %v25_v60 = vld [vmem:[%s1456_s2 + $0x38] sm:$0xff]  ;;  %v23_v62 = vld [vmem:[%s1456_s2 + $0x28] sm:$0xff]  ;;  %p1187_p0 = scmp.ne.s32.totalorder %s953_s12, %s1186_s13  ;;  %p1192_p2 = scmp.lt.s32.totalorder %s1186_s13, %s1186_s13 }
   0x9   :  { %1061 = vmatprep.subr.mxu1 %v1208_v3  ;;  %1080 = vmatpush3.msra.mxu0 %v1256_v5 }
   0xa   :  { %1062 = vmatpush3.msra.mxu1 %v1274_v7  ;;  %1081 = vmatprep.subr.mxu0 %v1208_v3  ;;  %p1193_p3 = por %p1192_p2, %p1191_p1 }
   0xb   :  { %1064 = vmatmul.mubr.msk.f32.vlgmr.msra.gmra.mxu1 %vm178_vm2, %v1281_v8  ;;  %1066 = vmatprep.subr.mxu1 %v1208_v3 }
   0xc   :  { %1067 = vmatpush3.msra.mxu1 %v1246_v2  ;;  %1074 = vmatprep.mubr.msk.f32.mxu1 %vm1209_vm1, %v1208_v3  ;;  %p1194_p4 = pnand %p1193_p3, %p1187_p0 }
   0xd   :  { %1068 = vmatprep.subr.mxu1 %v1208_v3  ;;  %1082 = vmatpush3.msra.mxu0 %v1264_v6 }
   0xe   :  { %1069 = vmatpush3.msra.mxu1 %v1256_v5  ;;  %1083 = vmatprep.subr.mxu0 %v1208_v3 }
   0xf   :  { %1070 = vmatprep.subr.mxu1 %v1208_v3  ;;  %1084 = vmatpush3.msra.mxu0 %v1274_v7 }
  0x10   :  { %1071 = vmatpush3.msra.mxu1 %v1264_v6  ;;  %1099 = vmatprep.subr.mxu0 %v1208_v3 }
  0x11   :  { %1072 = vmatprep.subr.mxu1 %v1208_v3  ;;  %1046 = vmatprep.mubr.msk.f32.mxu0 %vm48_vm0, %v38_v17 }
  0x12   :  { %1073 = vmatpush3.msra.mxu1 %v1274_v7  ;;  %1047 = vmatmul.mubr.msk.f32.gmra.mxu0 %vm48_vm0, %v39_v18  ;;  %v980_v18 = vld [vmem:[%s1457_s3 + $0x3] ss:$0 sm:$0xff] }
  0x13   :  { %1088 = vmatprep.subr.mxu1 %v1208_v3  ;;  %1049 = vmatprep.mubr.msk.f32.mxu0 %vm48_vm0, %v40_v19 }
  0x14   :  { %1169 = vset.pattern.permute.xlu0 %v1210_v63 }
  0x15   :  { %780 = vperm.xlu0 %1169, %v1281_v8   ;;  %v28_v8 = vld [vmem:[%s1456_s2 + $0x50] sm:$0xff] }
  0x16   :  { %1050 = vmatmul.mubr.msk.f32.gmra.mxu0 %vm48_vm0, %v41_v20 }
  0x17   :  { %1052 = vmatprep.mubr.msk.f32.mxu0 %vm48_vm0, %v42_v21 }
  0x1a   :  { %1053 = vmatmul.mubr.msk.f32.gmra.mxu0 %vm48_vm0, %v43_v22 }
  0x1b   :  { %1085 = vmatprep.mubr.msk.f32.mxu0 %vm1209_vm1, %v1208_v3 }
  0xc4   :  { %v1045_v9 = vpop.f32.mrf.mxu0 }
  0xc5   :  { %v145_v23 = vadd.f32 %v1045_v9, %v1308_v10  ;;  %v27_v9 = vld [vmem:[%s1456_s2 + $0x48] sm:$0xff] }
  0xc6   :  { %v139_v11 = vpop.f32.mrf.mxu0 }
  0xc7   :  { %v140_v12 = vadd.f32 %v1308_v10, %v139_v11  ;;  %v977_v11 = vld [vmem:[%s1457_s3 + $0x1] ss:$0 sm:$0xff] }
  0xcb   :  { %v248_v13 = vpop.f32.mrf.mxu1 }
  0xcc   :  { %v252_v14 = vadd.f32 %v248_v13, %v140_v12  ;;  %v979_v13 = vld [vmem:[%s1457_s3 + $0x2] ss:$0 sm:$0xff] }
  0xcd   :  { %v1065_v15 = vpop.f32.mrf.mxu1 }
  0xce   :  { %1170 = vtanh.f32 %v252_v14 }
  0xd2   :  { %v1048_v28 = vpop.f32.mrf.mxu0 }
  0xd3   :  { %v155_v39 = vadd.f32 %v1048_v28, %v1308_v10 }
  0xd4   :  { %v149_v29 = vpop.f32.mrf.mxu0 }
  0xd5   :  { %v150_v34 = vadd.f32 %v1308_v10, %v149_v29 }
  0xd6   :  { %v1051_v30 = vpop.f32.mrf.mxu0 }
  0xd7   :  { %v165_v49 = vadd.f32 %v1051_v30, %v1308_v10 }
  0xd8   :  { %v159_v31 = vpop.f32.mrf.mxu0 }
  0xd9   :  { %v160_v44 = vadd.f32 %v1308_v10, %v159_v31 }
  0xda   :  { %v1360_v32 = vpop.f32.mrf.mxu0 }
  0xdb   :  { %v1171_v16 = vpop.eup %1170  ;;  %v175_v0 = vadd.f32 %v1360_v32, %v1308_v10 }
  0xdc   :  { %1075 = vmatmul.mubr.msk.f32.vlgmr.msra.gmra.mxu1 %vm178_vm2, %v1171_v16  ;;  %v169_v33 = vpop.f32.mrf.mxu0 }
  0xdd   :  { %1089 = vmatpush3.msra.mxu1 %v1246_v2  ;;  %1096 = vmatprep.mubr.msk.f32.mxu1 %vm1209_vm1, %v1208_v3  ;;  %v170_v54 = vadd.f32 %v1308_v10, %v169_v33  ;;  %v781_v10 = vpop.permute.xlu0 %780 }
  0xde   :  { %1090 = vmatprep.subr.mxu1 %v1208_v3  ;;  %v787_v12 = vmul.f32 %v977_v11, %v781_v10 }
  0xdf   :  { %1091 = vmatpush3.msra.mxu1 %v1256_v5 }
  0xe0   :  { %1092 = vmatprep.subr.mxu1 %v1208_v3 }
  0xe1   :  { %1093 = vmatpush3.msra.mxu1 %v1264_v6 }
  0xe2   :  { %1094 = vmatprep.subr.mxu1 %v1208_v3 }
  0xe3   :  { %1095 = vmatpush3.msra.mxu1 %v1274_v7 }
  0xe4   :  { %1110 = vmatprep.subr.mxu1 %v1208_v3 }
 0x19c   :  { %v323_v24 = vpop.f32.mrf.mxu1 }
 0x19d   :  { %v327_v25 = vadd.f32 %v323_v24, %v145_v23 }
 0x19e   :  { %v1076_v26 = vpop.f32.mrf.mxu1 }
 0x19f   :  { %1172 = vtanh.f32 %v327_v25 }
 0x1ac   :  { %v1173_v27 = vpop.eup %1172 }
 0x1ad   :  { %1086 = vmatmul.mubr.msk.f32.vlgmr.msra.gmra.mxu0 %vm178_vm2, %v1173_v27 }
 0x1ae   :  { %1100 = vmatpush3.msra.mxu0 %v1246_v2  ;;  %1107 = vmatprep.mubr.msk.f32.mxu0 %vm1209_vm1, %v1208_v3 }
 0x1af   :  { %1101 = vmatprep.subr.mxu0 %v1208_v3 }
 0x1b0   :  { %1102 = vmatpush3.msra.mxu0 %v1256_v5 }
 0x1b1   :  { %1103 = vmatprep.subr.mxu0 %v1208_v3 }
 0x1b2   :  { %1104 = vmatpush3.msra.mxu0 %v1264_v6 }
 0x1b3   :  { %1105 = vmatprep.subr.mxu0 %v1208_v3 }
 0x1b4   :  { %1106 = vmatpush3.msra.mxu0 %v1274_v7 }
 0x1b5   :  { %1121 = vmatprep.subr.mxu0 %v1208_v3 }
 0x26d   :  { %v398_v35 = vpop.f32.mrf.mxu0 }
 0x26e   :  { %v402_v36 = vadd.f32 %v398_v35, %v150_v34 }
 0x26f   :  { %v1087_v37 = vpop.f32.mrf.mxu0 }
 0x270   :  { %1174 = vtanh.f32 %v402_v36 }
 0x27d   :  { %v1175_v38 = vpop.eup %1174 }
 0x27e   :  { %1097 = vmatmul.mubr.msk.f32.vlgmr.msra.gmra.mxu1 %vm178_vm2, %v1175_v38 }
 0x27f   :  { %1111 = vmatpush3.msra.mxu1 %v1246_v2  ;;  %1118 = vmatprep.mubr.msk.f32.mxu1 %vm1209_vm1, %v1208_v3 }
 0x280   :  { %1112 = vmatprep.subr.mxu1 %v1208_v3 }
 0x281   :  { %1113 = vmatpush3.msra.mxu1 %v1256_v5 }
 0x282   :  { %1114 = vmatprep.subr.mxu1 %v1208_v3 }
 0x283   :  { %1115 = vmatpush3.msra.mxu1 %v1264_v6 }
 0x284   :  { %1116 = vmatprep.subr.mxu1 %v1208_v3 }
 0x285   :  { %1117 = vmatpush3.msra.mxu1 %v1274_v7 }
 0x286   :  { %1132 = vmatprep.subr.mxu1 %v1208_v3 }
 0x33e   :  { %v473_v40 = vpop.f32.mrf.mxu1 }
 0x33f   :  { %v477_v41 = vadd.f32 %v473_v40, %v155_v39 }
 0x340   :  { %v1098_v42 = vpop.f32.mrf.mxu1 }
 0x341   :  { %1176 = vtanh.f32 %v477_v41 }
 0x34e   :  { %v1177_v43 = vpop.eup %1176 }
 0x34f   :  { %1108 = vmatmul.mubr.msk.f32.vlgmr.msra.gmra.mxu0 %vm178_vm2, %v1177_v43 }
 0x350   :  { %1122 = vmatpush3.msra.mxu0 %v1246_v2  ;;  %1129 = vmatprep.mubr.msk.f32.mxu0 %vm1209_vm1, %v1208_v3 }
 0x351   :  { %1123 = vmatprep.subr.mxu0 %v1208_v3 }
 0x352   :  { %1124 = vmatpush3.msra.mxu0 %v1256_v5 }
 0x353   :  { %1125 = vmatprep.subr.mxu0 %v1208_v3 }
 0x354   :  { %1126 = vmatpush3.msra.mxu0 %v1264_v6 }
 0x355   :  { %1127 = vmatprep.subr.mxu0 %v1208_v3 }
 0x356   :  { %1128 = vmatpush3.msra.mxu0 %v1274_v7 }
 0x357   :  { %1143 = vmatprep.subr.mxu0 %v1208_v3 }
 0x40f   :  { %v548_v45 = vpop.f32.mrf.mxu0 }
 0x410   :  { %v552_v46 = vadd.f32 %v548_v45, %v160_v44 }
 0x411   :  { %v1109_v47 = vpop.f32.mrf.mxu0 }
 0x412   :  { %1178 = vtanh.f32 %v552_v46 }
 0x41f   :  { %v1179_v48 = vpop.eup %1178 }
 0x420   :  { %1119 = vmatmul.mubr.msk.f32.vlgmr.msra.gmra.mxu1 %vm178_vm2, %v1179_v48 }
 0x421   :  { %1133 = vmatpush3.msra.mxu1 %v1246_v2  ;;  %1140 = vmatprep.mubr.msk.f32.mxu1 %vm1209_vm1, %v1208_v3 }
 0x422   :  { %1134 = vmatprep.subr.mxu1 %v1208_v3 }
 0x423   :  { %1135 = vmatpush3.msra.mxu1 %v1256_v5 }
 0x424   :  { %1136 = vmatprep.subr.mxu1 %v1208_v3 }
 0x425   :  { %1137 = vmatpush3.msra.mxu1 %v1264_v6  ;;  %v30_v6 = vld [vmem:[%s1456_s2 + $0x60] sm:$0xff] }
 0x426   :  { %1138 = vmatprep.subr.mxu1 %v1208_v3 }
 0x427   :  { %1139 = vmatpush3.msra.mxu1 %v1274_v7  ;;  %v29_v7 = vld [vmem:[%s1456_s2 + $0x58] sm:$0xff] }
 0x428   :  { %1154 = vmatprep.subr.mxu1 %v1208_v3 }
 0x4e0   :  { %v623_v50 = vpop.f32.mrf.mxu1 }
 0x4e1   :  { %v627_v51 = vadd.f32 %v623_v50, %v165_v49 }
 0x4e2   :  { %v1120_v52 = vpop.f32.mrf.mxu1 }
 0x4e3   :  { %1180 = vtanh.f32 %v627_v51 }
 0x4f0   :  { %v1181_v53 = vpop.eup %1180 }
 0x4f1   :  { %1130 = vmatmul.mubr.msk.f32.vlgmr.msra.gmra.mxu0 %vm178_vm2, %v1181_v53 }
 0x4f2   :  { %1151 = vmatprep.mubr.msk.f32.mxu0 %vm1209_vm1, %v1208_v3  ;;  %1144 = vmatpush3.msra.mxu0 %v26_v59 }
 0x4f3   :  { %1145 = vmatprep.subr.mxu0 %v1208_v3 }
 0x4f4   :  { %1146 = vmatpush3.msra.mxu0 %v25_v60 }
 0x4f5   :  { %1147 = vmatprep.subr.mxu0 %v1208_v3 }
 0x4f6   :  { %1148 = vmatpush3.msra.mxu0 %v24_v61 }
 0x4f7   :  { %1149 = vmatprep.subr.mxu0 %v1208_v3 }
 0x4f8   :  { %1150 = vmatpush3.msra.mxu0 %v23_v62 }
 0x5b1   :  { %v698_v55 = vpop.f32.mrf.mxu0 }
 0x5b2   :  { %v702_v56 = vadd.f32 %v698_v55, %v170_v54 }
 0x5b3   :  { %v1131_v57 = vpop.f32.mrf.mxu0 }
 0x5b4   :  { %1182 = vtanh.f32 %v702_v56 }
 0x5c1   :  { %v1183_v58 = vpop.eup %1182 }
 0x5c2   :  { %1141 = vmatmul.mubr.msk.f32.vlgmr.msra.gmra.mxu1 %vm178_vm2, %v1183_v58 }
 0x5c3   :  { %1162 = vmatprep.mubr.msk.f32.mxu1 %vm1209_vm1, %v1208_v3  ;;  %1155 = vmatpush3.msra.mxu1 %v30_v6 }
 0x5c4   :  { %1156 = vmatprep.subr.mxu1 %v1208_v3 }
 0x5c5   :  { %1157 = vmatpush3.msra.mxu1 %v29_v7 }
 0x5c6   :  { %1158 = vmatprep.subr.mxu1 %v1208_v3 }
 0x5c7   :  { %1159 = vmatpush3.msra.mxu1 %v28_v8 }
 0x5c8   :  { %1160 = vmatprep.subr.mxu1 %v1208_v3 }
 0x5c9   :  { %1161 = vmatpush3.msra.mxu1 %v27_v9 }
 0x682   :  { %v773_v1 = vpop.f32.mrf.mxu1 }
 0x683   :  { %v777_v2 = vadd.f32 %v773_v1, %v175_v0 }
 0x684   :  { %v1142_v4 = vpop.f32.mrf.mxu1 }
 0x685   :  { %1184 = vtanh.f32 %v777_v2 }
 0x692   :  { %v1185_v5 = vpop.eup %1184 }
 0x693   :  { %1152 = vmatmul.mubr.msk.f32.vlgmr.msra.gmra.mxu0 %vm178_vm2, %v1185_v5 }
 0x753   :  { %v857_v14 = vpop.f32.mrf.mxu0 }
 0x754   :  { %v858_v15 = vadd.f32 %v857_v14, %v787_v12 }
 0x755   :  { %v1153_v16 = vpop.f32.mrf.mxu0 }
 0x756   :  { %v865_v17 = vadd.f32 %v979_v13, %v858_v15 }
 0x758   :  { %v866_v3 = vmax.f32 %v865_v17, 0.0 }
 0x75a   :  { %1163 = vmatmul.mubr.msk.f32.vlgmr.msra.gmra.mxu1 %vm178_vm2, %v866_v3 }
 0x81a   :  { %v940_v19 = vpop.f32.mrf.mxu1 }
 0x81b   :  { %v941_v20 = vadd.f32 %v980_v18, %v940_v19 }
 0x81c   :  { %v1164_v21 = vpop.f32.mrf.mxu1 }
 0x81d   :  { %v944_v22 = vmax.f32 %v941_v20, 0.0 }
 0x81f   :  { %945 = vst.msk [vmem:[#allocation2] sm:$0xff] %vm178_vm2, %v944_v22 }
 0x820   :  { %1197 = shalt.err (!%p1194_p4)
}
 0x821   :  { %955 = dma.vmem_to_hbm [thread:$0]  %s953_s12, 128, %s1458_s4, [#allocation3]  }
 0x822   :  { %1206 = dma.done.wait [#allocation3], 128  }
 0x823   :  { %1207 = vsyncadd [#allocation3], 4294967168 }
 0x824   :  { %959 = vsyncpa [#allocation3], 1 }

</bundles_post_ra>
